<compile_context>
chip_gen: v5e
topology: v5e:2x2
jax: 0.10.0
libtpu: 0.0.40
codegen_flags: <defaults>
</compile_context>

<pallas_src>
import functools

import jax
import jax.numpy as jnp
from jax import lax
from jax.experimental import pallas as pl
from jax.experimental.pallas import tpu as pltpu


def _round_up(x, m):
    return ((x + m - 1) // m) * m


def _weight_generator_kernel(z_ref, w1t_ref, b1_ref, w2t_ref, b2_ref, o_ref):
    # z tile is batch-major (TB, latent): one contiguous DMA from HBM.
    z = z_ref[...]                                               # (TB, L) f32

    # Layer 1, feature-major result: h[H, TB] = W1^T @ z^T.
    # Transposed contraction (latent of w1t against latent of z) is handled by
    # the MXU directly -- no data movement, no wrapper-side transpose of z.
    h = lax.dot_general(w1t_ref[...], z, (((1,), (1,)), ((), ())),
                        preferred_element_type=jnp.float32)      # (H, TB)
    h = jnp.maximum(h + b1_ref[...], 0.0)                        # bias + ReLU

    # Layer 2: logits[n_series, TB] = W2^T @ h (standard MXU matmul).
    logits = jnp.dot(w2t_ref[...], h,
                     preferred_element_type=jnp.float32) + b2_ref[...]

    # Numerically stable softmax over the n_series axis (axis=0 here ==
    # PyTorch dim=1 of the (B, n_series) result).  Feature-major keeps every
    # VPU/EUP op lane-dense.  Exact divide so rows sum to 1 to f32 precision.
    m = jnp.max(logits, axis=0, keepdims=True)
    e = jnp.exp(logits - m)
    denom = jnp.sum(e, axis=0, keepdims=True)
    o_ref[...] = (e / denom).astype(o_ref.dtype)


@functools.partial(jax.jit, static_argnames=("block_b",))
def weight_generator_forward_fm(z, w1, b1, w2, b2, block_b=8192):
    """Fused Linear->ReLU->Linear->Softmax.  Returns the FEATURE-MAJOR result
    (n_series, B); consumers should contract against it directly (folding the
    transpose into their dot_general) to avoid an extra HBM pass.

    z : (B, latent_dim) f32 (PyTorch layout, fed as-is, batch-major).
    w1: (latent_dim, H), b1: (H,), w2: (H, n_series), b2: (n_series,)
        (i.e. PyTorch linear.weight.T / linear.bias)."""
    B, latent_dim = z.shape
    hidden = w1.shape[1]
    n_series = w2.shape[1]

    # ---- batch tiling ------------------------------------------------------
    # Big tiles amortize the ~0.35us fixed per-grid-step pipeline overhead
    # (at TB=512 the kernel was step-overhead-bound, not HBM/MXU-bound).
    # Keep >= 2 grid steps whenever the batch allows it so ("parallel",) can
    # use both v7x TensorCores.  TB is capped relative to B to limit padding.
    Bp128 = _round_up(B, 128)                       # lane-aligned batch
    n_tiles = max(1, pl.cdiv(Bp128, block_b))
    if n_tiles == 1 and Bp128 >= 2 * 128:
        n_tiles = 2
    TB = _round_up(pl.cdiv(Bp128, n_tiles), 128)
    Bp = _round_up(B, TB)

    if Bp != B:                                     # pad only when needed
        z = jnp.pad(z, ((0, Bp - B), (0, 0)))

    # Tiny (KB-scale) weight reshapes; VMEM-resident across all grid steps.
    w1t = jnp.asarray(w1, jnp.float32).T                        # (H, L)
    w2t = jnp.asarray(w2, jnp.float32).T                        # (n_series, H)
    b1c = jnp.reshape(b1, (-1, 1)).astype(jnp.float32)          # (H, 1)
    b2c = jnp.reshape(b2, (-1, 1)).astype(jnp.float32)          # (n_series, 1)

    cost = pl.CostEstimate(
        flops=2 * Bp * (latent_dim * hidden + hidden * n_series),
        transcendentals=Bp * n_series,
        bytes_accessed=Bp * 4 * (latent_dim + n_series)
        + 4 * (latent_dim * hidden + hidden * n_series + hidden + n_series),
    )

    out_fm = pl.pallas_call(
        _weight_generator_kernel,
        out_shape=jax.ShapeDtypeStruct((n_series, Bp), jnp.float32),
        grid=(Bp // TB,),
        in_specs=[
            pl.BlockSpec((TB, latent_dim), lambda i: (i, 0)),       # z (streamed, contiguous)
            pl.BlockSpec((hidden, latent_dim), lambda i: (0, 0)),   # W1^T (resident)
            pl.BlockSpec((hidden, 1), lambda i: (0, 0)),            # b1   (resident)
            pl.BlockSpec((n_series, hidden), lambda i: (0, 0)),     # W2^T (resident)
            pl.BlockSpec((n_series, 1), lambda i: (0, 0)),          # b2   (resident)
        ],
        out_specs=pl.BlockSpec((n_series, TB), lambda i: (0, i)),   # lane-dense store
        compiler_params=pltpu.CompilerParams(
            dimension_semantics=("parallel",)),
        cost_estimate=cost,
    )(z, w1t, b1c, w2t, b2c)
    # TODO(synk): on hardware, sweep pl.Buffered(1) on the resident specs and
    # pl.Buffered(2-3) on the streamed z/output specs (minor, version-dependent).

    return out_fm[:, :B]


def weight_generator_forward(z, w1, b1, w2, b2, block_b=8192):
    """PyTorch-shaped (B, n_series) output.  The trailing .T is an extra XLA
    pass kept only for API parity / testing; in a pipeline prefer
    weight_generator_forward_fm and fuse the transpose into the consumer."""
    return weight_generator_forward_fm(z, w1, b1, w2, b2, block_b=block_b).T


def init_params(key, latent_dim, n_series, hidden=32):
    """Deterministic synthetic parameter init (PyTorch-like uniform ranges)."""
    k1, k2, k3, k4 = jax.random.split(key, 4)
    bound1 = 1.0 / jnp.sqrt(latent_dim)
    bound2 = 1.0 / jnp.sqrt(hidden)
    w1 = jax.random.uniform(k1, (latent_dim, hidden), jnp.float32, -bound1, bound1)
    b1 = jax.random.uniform(k2, (hidden,), jnp.float32, -bound1, bound1)
    w2 = jax.random.uniform(k3, (hidden, n_series), jnp.float32, -bound2, bound2)
    b2 = jax.random.uniform(k4, (n_series,), jnp.float32, -bound2, bound2)
    return w1, b1, w2, b2


if __name__ == "__main__":
    latent_dim, n_series, hidden = 16, 8, 32

    key = jax.random.PRNGKey(0)
    kz, kp = jax.random.split(key)
    w1, b1, w2, b2 = init_params(kp, latent_dim, n_series, hidden)

    def ref_forward(zz):
        h = jnp.maximum(zz @ w1 + b1, 0.0)
        return jax.nn.softmax(h @ w2 + b2, axis=1)

    # Tiny case (matches the module's toy usage) + a multi-tile case that
    # exercises the batch grid (B=1024 -> two 512-row tiles, >=2 grid steps).
    for batch in (4, 1024):
        zb = jax.random.normal(jax.random.fold_in(kz, batch),
                               (batch, latent_dim), jnp.float32)
        out = jax.block_until_ready(weight_generator_forward(zb, w1, b1, w2, b2))
        ref = ref_forward(zb)
        assert out.shape == (batch, n_series)
        assert jnp.allclose(out, ref, atol=1e-5), "mismatch vs reference"
        assert jnp.allclose(jnp.sum(out, axis=1), 1.0, atol=1e-5), "rows must sum to ~1"

    print("KERNEL_OK")
</pallas_src>

<mosaic_0001>
module attributes {stable_mosaic.version = 11 : i64} {
  func.func @_weight_generator_kernel(%arg0: i32, %arg1: memref<128x16xf32, #tpu.memory_space<vmem>>, %arg2: memref<32x16xf32, #tpu.memory_space<vmem>>, %arg3: memref<32x1xf32, #tpu.memory_space<vmem>>, %arg4: memref<8x32xf32, #tpu.memory_space<vmem>>, %arg5: memref<8x1xf32, #tpu.memory_space<vmem>>, %arg6: memref<8x128xf32, #tpu.memory_space<vmem>>) attributes {dimension_semantics = [#tpu.dimension_semantics<parallel>], iteration_bounds = array<i64: 1>, scalar_prefetch = 0 : i64, scratch_operands = 0 : i64, tpu.core_type = #tpu.core_type<tc>, window_params = [{transform_indices = @transform_0, window_bounds = array<i64: 128, 16>}, {pipeline_mode = #tpu.pipeline_mode<synchronous>, transform_indices = @transform_1, window_bounds = array<i64: 32, 16>}, {pipeline_mode = #tpu.pipeline_mode<synchronous>, transform_indices = @transform_2, window_bounds = array<i64: 32, 1>}, {pipeline_mode = #tpu.pipeline_mode<synchronous>, transform_indices = @transform_3, window_bounds = array<i64: 8, 32>}, {pipeline_mode = #tpu.pipeline_mode<synchronous>, transform_indices = @transform_4, window_bounds = array<i64: 8, 1>}, {transform_indices = @transform_5, window_bounds = array<i64: 8, 128>}]} {
    %c0 = arith.constant 0 : index
    %c0_0 = arith.constant 0 : index
    %0 = vector.load %arg1[%c0, %c0_0] : memref<128x16xf32, #tpu.memory_space<vmem>>, vector<128x16xf32>
    %c0_1 = arith.constant 0 : index
    %c0_2 = arith.constant 0 : index
    %1 = vector.load %arg2[%c0_1, %c0_2] : memref<32x16xf32, #tpu.memory_space<vmem>>, vector<32x16xf32>
    %cst = arith.constant dense<0.000000e+00> : vector<32x128xf32>
    %2 = tpu.matmul %1, %0, %cst {dimension_numbers = #tpu.dot_dimension_numbers<[1], [1], [0], [0], [0, 0, 1, 0], [], []>} : vector<32x16xf32>, vector<128x16xf32>, vector<32x128xf32> -> vector<32x128xf32>
    %c0_3 = arith.constant 0 : index
    %c0_4 = arith.constant 0 : index
    %3 = vector.load %arg3[%c0_3, %c0_4] : memref<32x1xf32, #tpu.memory_space<vmem>>, vector<32x1xf32>
    %4 = vector.broadcast %3 : vector<32x1xf32> to vector<32x128xf32>
    %5 = arith.addf %2, %4 : vector<32x128xf32>
    %cst_5 = arith.constant 0.000000e+00 : f32
    %6 = vector.broadcast %cst_5 : f32 to vector<32x128xf32>
    %7 = arith.maximumf %5, %6 : vector<32x128xf32>
    %c0_6 = arith.constant 0 : index
    %c0_7 = arith.constant 0 : index
    %8 = vector.load %arg4[%c0_6, %c0_7] : memref<8x32xf32, #tpu.memory_space<vmem>>, vector<8x32xf32>
    %cst_8 = arith.constant dense<0.000000e+00> : vector<8x128xf32>
    %9 = tpu.matmul %8, %7, %cst_8 {dimension_numbers = #tpu.dot_dimension_numbers<[1], [0], [0], [1], [0, 0, 1, 1], [], []>} : vector<8x32xf32>, vector<32x128xf32>, vector<8x128xf32> -> vector<8x128xf32>
    %c0_9 = arith.constant 0 : index
    %c0_10 = arith.constant 0 : index
    %10 = vector.load %arg5[%c0_9, %c0_10] : memref<8x1xf32, #tpu.memory_space<vmem>>, vector<8x1xf32>
    %11 = vector.broadcast %10 : vector<8x1xf32> to vector<8x128xf32>
    %12 = arith.addf %9, %11 : vector<8x128xf32>
    %cst_11 = arith.constant dense<0xFF800000> : vector<128xf32>
    %13 = vector.multi_reduction <maximumf>, %12, %cst_11 [0] : vector<8x128xf32> to vector<128xf32>
    %14 = vector.shape_cast %13 : vector<128xf32> to vector<1x128xf32>
    %15 = vector.broadcast %14 : vector<1x128xf32> to vector<8x128xf32>
    %16 = arith.subf %12, %15 : vector<8x128xf32>
    %17 = math.exp %16 : vector<8x128xf32>
    %cst_12 = arith.constant dense<0.000000e+00> : vector<128xf32>
    %18 = vector.multi_reduction <add>, %17, %cst_12 [0] : vector<8x128xf32> to vector<128xf32>
    %19 = vector.shape_cast %18 : vector<128xf32> to vector<1x128xf32>
    %20 = vector.broadcast %19 : vector<1x128xf32> to vector<8x128xf32>
    %21 = arith.divf %17, %20 : vector<8x128xf32>
    %c0_13 = arith.constant 0 : index
    %c0_14 = arith.constant 0 : index
    %22 = vector.load %arg6[%c0_13, %c0_14] : memref<8x128xf32, #tpu.memory_space<vmem>>, vector<8x128xf32>
    tpu.vector_store %arg6[%c0_13, %c0_14], %21 {strides = array<i32>} : memref<8x128xf32, #tpu.memory_space<vmem>>, vector<8x128xf32>,
    return
  }
  func.func @transform_0(%arg0: i32) -> (i32, i32) {
    %c0_i32 = arith.constant 0 : i32
    %c0_i32_0 = arith.constant 0 : i32
    return %arg0, %c0_i32 : i32, i32
  }
  func.func @transform_1(%arg0: i32) -> (i32, i32) {
    %c0_i32 = arith.constant 0 : i32
    %c0_i32_0 = arith.constant 0 : i32
    %c0_i32_1 = arith.constant 0 : i32
    return %c0_i32, %c0_i32_0 : i32, i32
  }
  func.func @transform_2(%arg0: i32) -> (i32, i32) {
    %c0_i32 = arith.constant 0 : i32
    %c0_i32_0 = arith.constant 0 : i32
    %c0_i32_1 = arith.constant 0 : i32
    return %c0_i32, %c0_i32_0 : i32, i32
  }
  func.func @transform_3(%arg0: i32) -> (i32, i32) {
    %c0_i32 = arith.constant 0 : i32
    %c0_i32_0 = arith.constant 0 : i32
    %c0_i32_1 = arith.constant 0 : i32
    return %c0_i32, %c0_i32_0 : i32, i32
  }
  func.func @transform_4(%arg0: i32) -> (i32, i32) {
    %c0_i32 = arith.constant 0 : i32
    %c0_i32_0 = arith.constant 0 : i32
    %c0_i32_1 = arith.constant 0 : i32
    return %c0_i32, %c0_i32_0 : i32, i32
  }
  func.func @transform_5(%arg0: i32) -> (i32, i32) {
    %c0_i32 = arith.constant 0 : i32
    %c0_i32_0 = arith.constant 0 : i32
    return %c0_i32, %arg0 : i32, i32
  }
}

</mosaic_0001>

<bundles_post_ra>
// kernel: weight_generator_forward_fm.1
= control target key start
LH: loop header
LB: loop body
LE: loop exit
PB: predicated region body
PF: predicated region fallthrough
CT: control target
= control target key end

     0   :  { %vm64_vm0 = vcmask 130048   ;;  %v285_v10 = vmov 0   ;;  %vm165_vm1 = vcmask 261120   ;;  %s449_s0 = inlined_call_operand.vmem [shape: f32[128,16], index: 0, kind: input, shape index: {}]   ;;  %s450_s2 = inlined_call_operand.vmem [shape: f32[32,1], index: 2, kind: input, shape index: {}]   ;;  %s451_s1 = inlined_call_operand.vmem [shape: f32[32,16], index: 1, kind: input, shape index: {}]   ;;  %s452_s4 = inlined_call_operand.vmem [shape: f32[8,1], index: 4, kind: input, shape index: {}]   ;;  %s453_s3 = inlined_call_operand.vmem [shape: f32[8,32], index: 3, kind: input, shape index: {}]   ;;  %s454_s5 = inlined_call_operand.vmem [shape: f32[8,128], index: 5, kind: output, shape index: {}]  }
   0x1   :  { %v35_v0 = vld [vmem:[%s449_s0 + $0x78] sm:$0xff]  ;;  %v34_v1 = vld [vmem:[%s449_s0 + $0x70] sm:$0xff]  ;;  %v33_v2 = vld [vmem:[%s449_s0 + $0x68] sm:$0xff]  ;;  %278 = vset.pattern.permute.xlu0 %v285_v10  ;;  %279 = vset.pattern.permute.xlu1 %v285_v10 }
   0x2   :  { %246 = vmatpush.xpose.msk.msra.mxu3 %vm64_vm0, %v35_v0  ;;  %245 = vmatpush.xpose.msk.msra.mxu2 %vm64_vm0, %v35_v0  ;;  %v32_v3 = vld [vmem:[%s449_s0 + $0x60] sm:$0xff]  ;;  %v31_v4 = vld [vmem:[%s449_s0 + $0x58] sm:$0xff]  ;;  %v30_v5 = vld [vmem:[%s449_s0 + $0x50] sm:$0xff] }
   0x3   :  { %224 = vmatpush.xpose.msk.msra.mxu0 %vm64_vm0, %v35_v0  ;;  %v29_v6 = vld [vmem:[%s449_s0 + $0x48] sm:$0xff]  ;;  %v28_v7 = vld [vmem:[%s449_s0 + $0x40] sm:$0xff]  ;;  %v27_v8 = vld [vmem:[%s449_s0 + $0x38] sm:$0xff]  ;;  %280 = vset.pattern.permute.xlu2 %v285_v10 }
   0x4   :  { %v26_v9 = vld [vmem:[%s449_s0 + $0x30] sm:$0xff]  ;;  %v25_v11 = vld [vmem:[%s449_s0 + $0x28] sm:$0xff]  ;;  %v43_v12 = vld [vmem:[%s450_s2 + $0x18] sm:$0xff] }
   0x5   :  { %v41_v13 = vld [vmem:[%s450_s2 + $0x8] sm:$0xff]  ;;  %v24_v14 = vld [vmem:[%s449_s0 + $0x20] sm:$0xff]  ;;  %61 = vperm.xlu0 %278, %v43_v12   ;;  %v23_v15 = vld [vmem:[%s449_s0 + $0x18] sm:$0xff] }
   0x6   :  { %248 = vmatpush.xpose.msk.msra.mxu3 %vm64_vm0, %v34_v1  ;;  %247 = vmatpush.xpose.msk.msra.mxu2 %vm64_vm0, %v34_v1  ;;  %v42_v16 = vld [vmem:[%s450_s2 + $0x10] sm:$0xff]  ;;  %v40_v17 = vld [vmem:[%s450_s2] sm:$0xff]  ;;  %v21_v19 = vld [vmem:[%s449_s0 + $0x8] sm:$0xff] }
   0x7   :  { %225 = vmatpush.xpose.msk.msra.mxu0 %vm64_vm0, %v34_v1  ;;  %51 = vperm.xlu1 %279, %v41_v13   ;;  %v22_v18 = vld [vmem:[%s449_s0 + $0x10] sm:$0xff]  ;;  %v20_v20 = vld [vmem:[%s449_s0] sm:$0xff]  ;;  %v37_v22 = vld [vmem:[%s451_s1 + $0x8] sm:$0xff] }
   0x8   :  { %v38_v21 = vld [vmem:[%s451_s1 + $0x10] sm:$0xff]  ;;  %v36_v23 = vld [vmem:[%s451_s1] sm:$0xff]  ;;  %v39_v24 = vld [vmem:[%s451_s1 + $0x18] sm:$0xff] }
   0x9   :  { %v159_v25 = vld [vmem:[%s452_s4] sm:$0xff] }
   0xa   :  { %250 = vmatpush.xpose.msk.msra.mxu3 %vm64_vm0, %v33_v2  ;;  %249 = vmatpush.xpose.msk.msra.mxu2 %vm64_vm0, %v33_v2  ;;  %v158_v42 = vld [vmem:[%s453_s3] sm:$0xff] }
   0xb   :  { %226 = vmatpush.xpose.msk.msra.mxu0 %vm64_vm0, %v33_v2  ;;  %162 = vperm.xlu2 %280, %v159_v25  }
   0xd   :  { %56 = vperm.xlu0 %278, %v42_v16  }
   0xe   :  { %252 = vmatpush.xpose.msk.msra.mxu3 %vm64_vm0, %v32_v3  ;;  %251 = vmatpush.xpose.msk.msra.mxu2 %vm64_vm0, %v32_v3 }
   0xf   :  { %227 = vmatpush.xpose.msk.msra.mxu0 %vm64_vm0, %v32_v3  ;;  %46 = vperm.xlu1 %279, %v40_v17  }
  0x12   :  { %254 = vmatpush.xpose.msk.msra.mxu3 %vm64_vm0, %v31_v4  ;;  %253 = vmatpush.xpose.msk.msra.mxu2 %vm64_vm0, %v31_v4 }
  0x13   :  { %228 = vmatpush.xpose.msk.msra.mxu0 %vm64_vm0, %v31_v4 }
  0x16   :  { %256 = vmatpush.xpose.msk.msra.mxu3 %vm64_vm0, %v30_v5  ;;  %255 = vmatpush.xpose.msk.msra.mxu2 %vm64_vm0, %v30_v5 }
  0x17   :  { %229 = vmatpush.xpose.msk.msra.mxu0 %vm64_vm0, %v30_v5 }
  0x1a   :  { %258 = vmatpush.xpose.msk.msra.mxu3 %vm64_vm0, %v29_v6  ;;  %257 = vmatpush.xpose.msk.msra.mxu2 %vm64_vm0, %v29_v6 }
  0x1b   :  { %230 = vmatpush.xpose.msk.msra.mxu0 %vm64_vm0, %v29_v6 }
  0x1e   :  { %260 = vmatpush.xpose.msk.msra.mxu3 %vm64_vm0, %v28_v7  ;;  %259 = vmatpush.xpose.msk.msra.mxu2 %vm64_vm0, %v28_v7 }
  0x1f   :  { %231 = vmatpush.xpose.msk.msra.mxu0 %vm64_vm0, %v28_v7 }
  0x22   :  { %262 = vmatpush.xpose.msk.msra.mxu3 %vm64_vm0, %v27_v8  ;;  %261 = vmatpush.xpose.msk.msra.mxu2 %vm64_vm0, %v27_v8 }
  0x23   :  { %232 = vmatpush.xpose.msk.msra.mxu0 %vm64_vm0, %v27_v8 }
  0x26   :  { %264 = vmatpush.xpose.msk.msra.mxu3 %vm64_vm0, %v26_v9  ;;  %263 = vmatpush.xpose.msk.msra.mxu2 %vm64_vm0, %v26_v9 }
  0x27   :  { %233 = vmatpush.xpose.msk.msra.mxu0 %vm64_vm0, %v26_v9 }
  0x2a   :  { %266 = vmatpush.xpose.msk.msra.mxu3 %vm64_vm0, %v25_v11  ;;  %265 = vmatpush.xpose.msk.msra.mxu2 %vm64_vm0, %v25_v11 }
  0x2b   :  { %234 = vmatpush.xpose.msk.msra.mxu0 %vm64_vm0, %v25_v11 }
  0x2e   :  { %268 = vmatpush.xpose.msk.msra.mxu3 %vm64_vm0, %v24_v14  ;;  %267 = vmatpush.xpose.msk.msra.mxu2 %vm64_vm0, %v24_v14 }
  0x2f   :  { %235 = vmatpush.xpose.msk.msra.mxu0 %vm64_vm0, %v24_v14 }
  0x32   :  { %270 = vmatpush.xpose.msk.msra.mxu3 %vm64_vm0, %v23_v15  ;;  %269 = vmatpush.xpose.msk.msra.mxu2 %vm64_vm0, %v23_v15 }
  0x33   :  { %236 = vmatpush.xpose.msk.msra.mxu0 %vm64_vm0, %v23_v15 }
  0x36   :  { %272 = vmatpush.xpose.msk.msra.mxu3 %vm64_vm0, %v22_v18  ;;  %271 = vmatpush.xpose.msk.msra.mxu2 %vm64_vm0, %v22_v18 }
  0x37   :  { %237 = vmatpush.xpose.msk.msra.mxu0 %vm64_vm0, %v22_v18 }
  0x3a   :  { %274 = vmatpush.xpose.msk.msra.mxu3 %vm64_vm0, %v21_v19  ;;  %273 = vmatpush.xpose.msk.msra.mxu2 %vm64_vm0, %v21_v19 }
  0x3b   :  { %238 = vmatpush.xpose.msk.msra.mxu0 %vm64_vm0, %v21_v19 }
  0x3e   :  { %276 = vmatpush.xpose.msk.msra.mxu3 %vm64_vm0, %v20_v20  ;;  %275 = vmatpush.xpose.msk.msra.mxu2 %vm64_vm0, %v20_v20 }
  0x3f   :  { %239 = vmatpush.xpose.msk.msra.mxu0 %vm64_vm0, %v20_v20 }
  0x41   :  { %242 = vmatmul.msk.f32.vlgmr.msra.gmra.mxu3 %vm64_vm0, %v38_v21  ;;  %241 = vmatmul.msk.f32.vlgmr.msra.gmra.mxu2 %vm64_vm0, %v37_v22 }
  0x42   :  { %240 = vmatmul.msk.f32.vlgmr.msra.gmra.mxu0 %vm64_vm0, %v36_v23 }
  0x49   :  { %243 = vmatmul.msk.f32.gmra.mxu3 %vm64_vm0, %v39_v24 }
  0x65   :  { %v163_v43 = vpop.permute.xlu2 %162 }
  0x77   :  { %v62_v26 = vpop.permute.xlu0 %61 }
  0x79   :  { %v52_v27 = vpop.permute.xlu1 %51 }
  0x7f   :  { %v57_v29 = vpop.permute.xlu0 %56 }
  0x81   :  { %v47_v34 = vpop.permute.xlu1 %46 }
  0xbf   :  { %v142_v35 = vpop.f32.mrf.mxu0 }
  0xc0   :  { %v143_v39 = vadd.f32 %v142_v35, %v47_v34 }
  0xc2   :  { %v154_v41 = vmax.f32 %v143_v39, 0.0 }
  0xc4   :  { %v148_v28 = vpop.f32.mrf.mxu3  ;;  %v145_v30 = vpop.f32.mrf.mxu2 }
  0xc5   :  { %v149_v32 = vadd.f32 %v148_v28, %v57_v29  ;;  %v146_v36 = vadd.f32 %v145_v30, %v52_v27 }
  0xc7   :  { %v156_v38 = vmax.f32 %v149_v32, 0.0  ;;  %v155_v40 = vmax.f32 %v146_v36, 0.0 }
  0xcc   :  { %v151_v31 = vpop.f32.mrf.mxu3 }
  0xcd   :  { %v152_v33 = vadd.f32 %v151_v31, %v62_v26 }
  0xcf   :  { %v157_v37 = vmax.f32 %v152_v33, 0.0 }
  0xd1   :  { %181 = vmatpush.msra.mxu1 %v157_v37 }
  0xd3   :  { %182 = vmatpush.msra.mxu1 %v156_v38 }
  0xd5   :  { %183 = vmatpush.msra.mxu1 %v155_v40 }
  0xd7   :  { %184 = vmatpush.msra.mxu1 %v154_v41 }
  0xd8   :  { %244 = vmatmul.msk.f32.vlgmr.msra.gmra.mxu1 %vm165_vm1, %v158_v42 }
 0x155   :  { %v186_v44 = vpop.f32.mrf.mxu1 }
 0x156   :  { %v187_v45 = vadd.f32 %v186_v44, %v163_v43 }
 0x158   :  { %v189_v46 = vrot.slane %v187_v45, 4 }
 0x15a   :  { %v190_v47 = vmax.f32 %v187_v45, %v189_v46 }
 0x15c   :  { %v191_v48 = vrot.slane %v190_v47, 2 }
 0x15e   :  { %v192_v49 = vmax.f32 %v190_v47, %v191_v48 }
 0x160   :  { %v193_v50 = vrot.slane %v192_v49, 1 }
 0x162   :  { %v194_v51 = vmax.f32 %v192_v49, %v193_v50 }
 0x164   :  { %v195_v52 = vsub.f32 %v187_v45, %v194_v51 }
 0x166   :  { %v196_v53 = vmul.f32 1.442695, %v195_v52 }
 0x168   :  { %281 = vpow2.f32 %v196_v53 }
 0x16e   :  { %v282_v54 = vpop.eup %281 }
 0x16f   :  { %v198_v55 = vrot.slane %v282_v54, 4 }
 0x171   :  { %v199_v56 = vadd.f32 %v282_v54, %v198_v55 }
 0x173   :  { %v200_v57 = vrot.slane %v199_v56, 2 }
 0x175   :  { %v201_v58 = vadd.f32 %v200_v57, %v199_v56 }
 0x177   :  { %v202_v59 = vrot.slane %v201_v58, 1 }
 0x179   :  { %v203_v60 = vadd.f32 %v202_v59, %v201_v58 }
 0x17b   :  { %283 = vrcp.f32 %v203_v60  ;;  %v215_v0 = vand.u32 2147483648, %v203_v60  ;;  %v213_v2 = vand.u32 2147483647, %v203_v60  ;;  %vm209_vm3 = vweird.f32 %v203_v60 }
 0x17d   :  { %v216_v4 = vor.u32 1.1754944e-38, %v215_v0  ;;  %vm214_vm5 = vcmp.eq.f32.partialorder %v213_v2, 8.507059e+37 }
 0x181   :  { %v284_v61 = vpop.eup %283 }
 0x182   :  { %v205_v62 = vmul.f32 %v284_v61, %v203_v60  ;;  %vm210_vm2 = vweird.f32 %v284_v61 }
 0x183   :  { %vm211_vm4 = vmor %vm209_vm3, %vm210_vm2 }
 0x184   :  { %v206_v63 = vsub.f32 1.0, %v205_v62 }
 0x186   :  { %v207_v1 = vmul.f32 %v284_v61, %v206_v63 }
 0x188   :  { %v208_v3 = vadd.f32 %v284_v61, %v207_v1 }
 0x18a   :  { %v212_v5 = vsel %vm211_vm4, %v284_v61, %v208_v3 }
 0x18b   :  { %v217_v6 = vsel %vm214_vm5, %v216_v4, %v212_v5 }
 0x18c   :  { %v218_v7 = vmul.f32 %v282_v54, %v217_v6 }
 0x18e   :  { %219 = vst [vmem:[%s454_s5] sm:$0xff] %v218_v7 }

</bundles_post_ra>
